<compile_context>
chip_gen: v6e
topology: v6e:2x2x1
jax: 0.10.0
libtpu: 0.0.40
codegen_flags: <defaults>
</compile_context>

<pallas_src>
import jax
import jax.numpy as jnp
import numpy as np
from jax.experimental import pallas as pl
from jax.experimental.pallas import tpu as pltpu

# ---- scaled-down hyper-parameters (consistent with the module structure) ----
B = 2                          # batch
FPN_CHANNELS = (32, 64, 128)   # stand-in for resnet50's [512, 1024, 2048]
D = 128                        # FPN out_channels (module uses 256)
REDUCTION = 16                 # SEBlock reduction -> hidden = D // 16 = 8
HID = D // REDUCTION           # 8
EMBED_DIM = 64                 # embedding_dim (module default 256)
OUT_PAD = 128                  # lane-dense output slab width (>= EMBED_DIM)
C_TOTAL = sum(FPN_CHANNELS)    # 224

# Row offsets inside the packed weight slab (all sublane-aligned: multiples of 8).
ROW_FPN_END = C_TOTAL                   # 224
ROW_W1_END = ROW_FPN_END + D            # 352
ROW_W2_END = ROW_W1_END + D             # 480
ROW_TAIL_END = ROW_W2_END + D           # 608

# TODO(synk): the pretrained torchvision ResNet-50 backbone is not reproduced;
# the kernel starts from the backbone's multi-scale feature maps.


# --------------------------- fused forward kernel ----------------------------
def _fused_kernel(x_ref, w_ref, b_ref, out_ref):
    dot = lambda a, m: jnp.dot(a, m, preferred_element_type=jnp.float32)

    # Static, sublane-aligned views into the packed weight / bias slabs.
    w_fpn = w_ref[0:ROW_FPN_END, :]            # (224, 128) folded FPN
    w_se1 = w_ref[ROW_FPN_END:ROW_W1_END, :]   # (128, 128) fc1 (lanes >= 8 zero)
    w_se2 = w_ref[ROW_W1_END:ROW_W2_END, :]    # (128, 128) fc2 (rows  >= 8 zero)
    w_tail = w_ref[ROW_W2_END:ROW_TAIL_END, :] # (128, 128) v/out_proj/embed fold
    b_fpn = b_ref[0:1, :]
    b_se1 = b_ref[1:2, :]
    b_se2 = b_ref[2:3, :]
    b_tail = b_ref[3:4, :]

    # FPN (laterals + top-down + 3x3 convs) + sum, pre-folded into one matmul.
    y = dot(x_ref[...], w_fpn) + b_fpn                            # (B, D)

    # SEBlock: GAP over 1x1 spatial is identity; fc1+ReLU, fc2+sigmoid gate.
    h = jnp.maximum(dot(y, w_se1) + b_se1, 0.0)                   # (B, 128)
    gate = jax.nn.sigmoid(dot(h, w_se2) + b_se2)                  # (B, D)
    y = y * gate

    # flatten -> seq_len 1 MHA (softmax == 1 => output == v) -> out_proj ->
    # embedding, all folded into one (D, OUT_PAD) matmul (zero-padded lanes).
    out_ref[...] = dot(y, w_tail) + b_tail                        # (B, OUT_PAD)


def fused_forward(x_cat, kp):
    vmem = pl.BlockSpec(memory_space=pltpu.MemorySpace.VMEM)
    return pl.pallas_call(
        _fused_kernel,
        out_shape=jax.ShapeDtypeStruct((B, OUT_PAD), jnp.float32),
        in_specs=[vmem, vmem, vmem],
        out_specs=vmem,
    )(x_cat, kp["w_slab"], kp["b_slab"])


# ------------------------ parameters (PyTorch shapes) ------------------------
def init_torch_like_params(key):
    ks = iter(jax.random.split(key, 40))

    def w(shape, scale=0.05):
        return scale * jax.random.normal(next(ks), shape, dtype=jnp.float32)

    p = {}
    p["lateral"] = [(w((D, c, 1, 1)), w((D,))) for c in FPN_CHANNELS]   # Conv2d 1x1
    p["fpn"] = [(w((D, D, 3, 3)), w((D,))) for _ in FPN_CHANNELS]       # Conv2d 3x3
    p["se_fc1"] = (w((HID, D)), w((HID,)))                              # Linear
    p["se_fc2"] = (w((D, HID)), w((D,)))                                # Linear
    p["in_proj_w"] = w((3 * D, D))                                      # MHA packed qkv
    p["in_proj_b"] = w((3 * D,))
    p["out_proj"] = (w((D, D)), w((D,)))                                # MHA out_proj
    p["embed"] = (w((EMBED_DIM, D)), w((EMBED_DIM,)))                   # Linear
    return p


def to_kernel_params(p):
    """Host-side exact algebraic folding of the forward pass (H = W = 1)."""
    hp = jax.lax.Precision.HIGHEST
    mm = lambda a, b: jnp.matmul(a, b, precision=hp)

    # ---- FPN fold ----
    # p2 = l2, p1 = l1 + l2, p0 = l0 + l1 + l2; out = sum_i fpn_i(p_i), so
    # out = l0@Wf0 + l1@(Wf0+Wf1) + l2@(Wf0+Wf1+Wf2) + (bf0+bf1+bf2),
    # with l_i = x_i @ Wl_i^T + bl_i (3x3 conv on a 1x1 map == centre tap).
    wl_t = [jnp.transpose(wc[:, :, 0, 0]) for wc, _ in p["lateral"]]    # (C_i, D)
    bl = [b.reshape(1, D) for _, b in p["lateral"]]
    wf_t = [jnp.transpose(wc[:, :, 1, 1]) for wc, _ in p["fpn"]]        # (D, D)
    bf = [b.reshape(1, D) for _, b in p["fpn"]]
    wf_cum = [wf_t[0], wf_t[0] + wf_t[1], wf_t[0] + wf_t[1] + wf_t[2]]

    w_fpn = jnp.concatenate([mm(wl_t[i], wf_cum[i]) for i in range(3)],
                            axis=0)                                     # (224, D)
    b_fpn = (mm(bl[0], wf_cum[0]) + mm(bl[1], wf_cum[1]) + mm(bl[2], wf_cum[2])
             + bf[0] + bf[1] + bf[2])                                   # (1, D)

    # ---- SE block, padded to lane-dense 128-wide slabs (exact: padding is 0) --
    w1 = jnp.pad(jnp.transpose(p["se_fc1"][0]), ((0, 0), (0, D - HID)))  # (D, 128)
    b1 = jnp.pad(p["se_fc1"][1].reshape(1, HID), ((0, 0), (0, D - HID))) # (1, 128)
    w2 = jnp.pad(jnp.transpose(p["se_fc2"][0]), ((0, D - HID), (0, 0)))  # (128, D)
    b2 = p["se_fc2"][1].reshape(1, D)

    # ---- tail fold: v-proj -> out_proj -> embedding (q/k are dead: seq==1) ----
    _wq, _wk, wv = jnp.split(p["in_proj_w"], 3, axis=0)
    _bq, _bk, bv = jnp.split(p["in_proj_b"], 3, axis=0)
    wo, bo = p["out_proj"]
    we, be = p["embed"]
    w_tail = mm(mm(jnp.transpose(wv), jnp.transpose(wo)),
                jnp.transpose(we))                                      # (D, EMBED)
    b_tail = (mm(mm(bv.reshape(1, D), jnp.transpose(wo)), jnp.transpose(we))
              + mm(bo.reshape(1, D), jnp.transpose(we))
              + be.reshape(1, EMBED_DIM))                               # (1, EMBED)
    w_tail = jnp.pad(w_tail, ((0, 0), (0, OUT_PAD - EMBED_DIM)))        # (D, 128)
    b_tail = jnp.pad(b_tail, ((0, 0), (0, OUT_PAD - EMBED_DIM)))        # (1, 128)

    # ---- pack: one weight slab + one bias slab (3 input DMAs total) ----
    w_slab = jnp.concatenate([w_fpn, w1, w2, w_tail], axis=0)           # (608, 128)
    b_slab = jnp.concatenate([b_fpn, b1, b2, b_tail], axis=0)           # (4, 128)
    return {"w_slab": w_slab, "b_slab": b_slab}


# ------------------------------ forward wrapper ------------------------------
def advanced_feature_extractor(features_nchw, kp):
    # features_nchw: list of (B, C_i, 1, 1) NCHW backbone feature maps.
    for f in features_nchw:
        assert f.shape[2] == 1 and f.shape[3] == 1, (
            "kernel implements the H=W=1 case the reference forward requires")
    x_cat = jnp.concatenate([f[:, :, 0, 0] for f in features_nchw], axis=1)
    out_pad = fused_forward(x_cat, kp)                  # (B, 128) lane-dense slab
    return out_pad[:, :EMBED_DIM]                       # (B, EMBED_DIM)


# --------------------------- pure-JAX reference ------------------------------
def reference_forward(features_nchw, p):
    feats = [f[:, :, 0, 0] for f in features_nchw]
    lats = [f @ wc[:, :, 0, 0].T + b for f, (wc, b) in zip(feats, p["lateral"])]
    p2 = lats[2]
    p1 = p2 + lats[1]
    p0 = p1 + lats[0]
    outs = [p0, p1, p2]
    fpn_outs = [o @ wc[:, :, 1, 1].T + b for o, (wc, b) in zip(outs, p["fpn"])]
    y = fpn_outs[0] + fpn_outs[1] + fpn_outs[2]
    w1, b1 = p["se_fc1"]; w2, b2 = p["se_fc2"]
    gate = jax.nn.sigmoid(jnp.maximum(y @ w1.T + b1, 0.0) @ w2.T + b2)
    y = y * gate
    _wq, _wk, wv = jnp.split(p["in_proj_w"], 3, axis=0)
    _bq, _bk, bv = jnp.split(p["in_proj_b"], 3, axis=0)
    v = y @ wv.T + bv                                   # softmax over seq-len 1 == 1
    a = v @ p["out_proj"][0].T + p["out_proj"][1]
    we, be = p["embed"]
    return a @ we.T + be


if __name__ == "__main__":
    key = jax.random.PRNGKey(0)
    kf, kparams = jax.random.split(key)
    fkeys = jax.random.split(kf, len(FPN_CHANNELS))
    features = [jax.random.normal(fk, (B, c, 1, 1), dtype=jnp.float32)
                for fk, c in zip(fkeys, FPN_CHANNELS)]

    params = init_torch_like_params(kparams)
    kernel_params = to_kernel_params(params)

    emb = advanced_feature_extractor(features, kernel_params)
    emb = jax.block_until_ready(emb)

    ref = reference_forward(features, params)
    assert emb.shape == (B, EMBED_DIM)
    np.testing.assert_allclose(np.asarray(emb), np.asarray(ref),
                               rtol=2e-2, atol=2e-3)
    print("KERNEL_OK")
</pallas_src>

<mosaic_0001>
module attributes {stable_mosaic.version = 11 : i64} {
  func.func @_fused_kernel(%arg0: memref<2x224xf32, #tpu.memory_space<vmem>>, %arg1: memref<608x128xf32, #tpu.memory_space<vmem>>, %arg2: memref<4x128xf32, #tpu.memory_space<vmem>>, %arg3: memref<2x128xf32, #tpu.memory_space<vmem>>) attributes {dimension_semantics = [], scalar_prefetch = 0 : i64, scratch_operands = 0 : i64, tpu.core_type = #tpu.core_type<tc>} {
    %c0 = arith.constant 0 : index
    %c0_0 = arith.constant 0 : index
    %0 = vector.load %arg1[%c0, %c0_0] : memref<608x128xf32, #tpu.memory_space<vmem>>, vector<224x128xf32>
    %c224 = arith.constant 224 : index
    %c0_1 = arith.constant 0 : index
    %1 = vector.load %arg1[%c224, %c0_1] : memref<608x128xf32, #tpu.memory_space<vmem>>, vector<128x128xf32>
    %c352 = arith.constant 352 : index
    %c0_2 = arith.constant 0 : index
    %2 = vector.load %arg1[%c352, %c0_2] : memref<608x128xf32, #tpu.memory_space<vmem>>, vector<128x128xf32>
    %c480 = arith.constant 480 : index
    %c0_3 = arith.constant 0 : index
    %3 = vector.load %arg1[%c480, %c0_3] : memref<608x128xf32, #tpu.memory_space<vmem>>, vector<128x128xf32>
    %c0_4 = arith.constant 0 : index
    %c0_5 = arith.constant 0 : index
    %4 = vector.load %arg2[%c0_4, %c0_5] : memref<4x128xf32, #tpu.memory_space<vmem>>, vector<1x128xf32>
    %c1 = arith.constant 1 : index
    %c0_6 = arith.constant 0 : index
    %5 = vector.load %arg2[%c1, %c0_6] : memref<4x128xf32, #tpu.memory_space<vmem>>, vector<1x128xf32>
    %c2 = arith.constant 2 : index
    %c0_7 = arith.constant 0 : index
    %6 = vector.load %arg2[%c2, %c0_7] : memref<4x128xf32, #tpu.memory_space<vmem>>, vector<1x128xf32>
    %c3 = arith.constant 3 : index
    %c0_8 = arith.constant 0 : index
    %7 = vector.load %arg2[%c3, %c0_8] : memref<4x128xf32, #tpu.memory_space<vmem>>, vector<1x128xf32>
    %c0_9 = arith.constant 0 : index
    %c0_10 = arith.constant 0 : index
    %8 = vector.load %arg0[%c0_9, %c0_10] : memref<2x224xf32, #tpu.memory_space<vmem>>, vector<2x224xf32>
    %cst = arith.constant dense<0.000000e+00> : vector<2x128xf32>
    %9 = tpu.matmul %8, %0, %cst {dimension_numbers = #tpu.dot_dimension_numbers<[1], [0], [0], [1], [0, 0, 1, 1], [], []>} : vector<2x224xf32>, vector<224x128xf32>, vector<2x128xf32> -> vector<2x128xf32>
    %10 = vector.broadcast %4 : vector<1x128xf32> to vector<2x128xf32>
    %11 = arith.addf %9, %10 : vector<2x128xf32>
    %cst_11 = arith.constant dense<0.000000e+00> : vector<2x128xf32>
    %12 = tpu.matmul %11, %1, %cst_11 {dimension_numbers = #tpu.dot_dimension_numbers<[1], [0], [0], [1], [0, 0, 1, 1], [], []>} : vector<2x128xf32>, vector<128x128xf32>, vector<2x128xf32> -> vector<2x128xf32>
    %13 = vector.broadcast %5 : vector<1x128xf32> to vector<2x128xf32>
    %14 = arith.addf %12, %13 : vector<2x128xf32>
    %cst_12 = arith.constant 0.000000e+00 : f32
    %15 = vector.broadcast %cst_12 : f32 to vector<2x128xf32>
    %16 = arith.maximumf %14, %15 : vector<2x128xf32>
    %cst_13 = arith.constant dense<0.000000e+00> : vector<2x128xf32>
    %17 = tpu.matmul %16, %2, %cst_13 {dimension_numbers = #tpu.dot_dimension_numbers<[1], [0], [0], [1], [0, 0, 1, 1], [], []>} : vector<2x128xf32>, vector<128x128xf32>, vector<2x128xf32> -> vector<2x128xf32>
    %18 = vector.broadcast %6 : vector<1x128xf32> to vector<2x128xf32>
    %19 = arith.addf %17, %18 : vector<2x128xf32>
    %20 = arith.negf %19 : vector<2x128xf32>
    %21 = math.exp %20 : vector<2x128xf32>
    %cst_14 = arith.constant 1.000000e+00 : f32
    %22 = vector.broadcast %cst_14 : f32 to vector<2x128xf32>
    %23 = arith.addf %22, %21 : vector<2x128xf32>
    %24 = arith.divf %22, %23 : vector<2x128xf32>
    %25 = arith.mulf %11, %24 : vector<2x128xf32>
    %cst_15 = arith.constant dense<0.000000e+00> : vector<2x128xf32>
    %26 = tpu.matmul %25, %3, %cst_15 {dimension_numbers = #tpu.dot_dimension_numbers<[1], [0], [0], [1], [0, 0, 1, 1], [], []>} : vector<2x128xf32>, vector<128x128xf32>, vector<2x128xf32> -> vector<2x128xf32>
    %27 = vector.broadcast %7 : vector<1x128xf32> to vector<2x128xf32>
    %28 = arith.addf %26, %27 : vector<2x128xf32>
    %c0_16 = arith.constant 0 : index
    %c0_17 = arith.constant 0 : index
    %29 = vector.load %arg3[%c0_16, %c0_17] : memref<2x128xf32, #tpu.memory_space<vmem>>, vector<2x128xf32>
    tpu.vector_store %arg3[%c0_16, %c0_17], %28 {strides = array<i32>} : memref<2x128xf32, #tpu.memory_space<vmem>>, vector<2x128xf32>,
    return
  }
}

</mosaic_0001>

<bundles_post_ra>
// kernel: tpu_custom_call.1
= control target key start
LH: loop header
LB: loop body
LE: loop exit
PB: predicated region body
PF: predicated region fallthrough
CT: control target
= control target key end

     0   :  { %8 = vsyncpa [#allocation3], 0  ;;  %s856_s0 = inlined_call_operand.hbm [shape: f32[2,224], index: 0, kind: input, shape index: {}]   ;;  %s857_s1 = inlined_call_operand.hbm [shape: f32[608,128], index: 1, kind: input, shape index: {}]   ;;  %s858_s2 = inlined_call_operand.hbm [shape: f32[4,128], index: 2, kind: input, shape index: {}]   ;;  %s859_s3 = inlined_call_operand.hbm [shape: f32[2,128], index: 3, kind: output, shape index: {}]  }
   0x1   :  { %9 = vsyncpa [#allocation6], 0 }
   0x2   :  { %10 = vsyncpa [#allocation4], 0  ;;  %s728_s12 = smov [#allocation5]  }
   0x3   :  { %s26_s13 = sshll.u32 %s728_s12, 4  ;;  %s27_s13 = int_to_ptr.vmem [resolvable:$true] %s26_s13 }
   0x4   :  { %s650_s14 = scalar_lea.vmem %s27_s13, 9728  ;;  %p655_p1 = scmp.lt.s32.totalorder %s27_s13, %s27_s13 }
   0x5   :  { %p651_p0 = scmp.ne.s32.totalorder %s27_s13, %s650_s14  ;;  %p656_p2 = scmp.lt.s32.totalorder %s650_s14, %s650_s14 }
   0x7   :  { %p657_p3 = por %p656_p2, %p655_p1 }
   0x9   :  { %p658_p4 = pnand %p657_p3, %p651_p0 }
   0xb   :  { %661 = shalt.err (!%p658_p4)
}
   0xc   :  { %s729_s15 = smov 128   ;;  %s730_s16 = smov 8  }
   0xd   :  { %32 = dma.hbm_to_vmem [thread:$0]  %s857_s1, 9728, %s27_s13, [#allocation6], %s729_s15, %s729_s15, %s730_s16  }
   0xe   :  { %s731_s19 = smov [#allocation2]   ;;  %s732_s21 = smov [#allocation7]  }
   0xf   :  { %s17_s20 = sshll.u32 %s731_s19, 4  ;;  %s39_s22 = sshll.u32 %s732_s21, 4  ;;  %s18_s20 = int_to_ptr.vmem [resolvable:$true] %s17_s20  ;;  %s40_s22 = int_to_ptr.vmem [resolvable:$true] %s39_s22 }
  0x10   :  { %s670_s23 = scalar_lea.vmem %s18_s20, 64  ;;  %p675_p6 = scmp.lt.s32.totalorder %s18_s20, %s18_s20 }
  0x11   :  { %p671_p5 = scmp.ne.s32.totalorder %s18_s20, %s670_s23  ;;  %p676_p7 = scmp.lt.s32.totalorder %s670_s23, %s670_s23 }
  0x13   :  { %p677_p8 = por %p676_p7, %p675_p6 }
  0x15   :  { %p678_p9 = pnand %p677_p8, %p671_p5 }
  0x17   :  { %681 = shalt.err (!%p678_p9)
}
  0x18   :  { %20 = dma.hbm_to_vmem [thread:$0]  %s856_s0, 64, %s18_s20, [#allocation3]  }
  0x19   :  { %s690_s26 = scalar_lea.vmem %s40_s22, 64  ;;  %p695_p11 = scmp.lt.s32.totalorder %s40_s22, %s40_s22 }
  0x1a   :  { %p691_p10 = scmp.ne.s32.totalorder %s40_s22, %s690_s26  ;;  %p696_p12 = scmp.lt.s32.totalorder %s690_s26, %s690_s26 }
  0x1c   :  { %p697_p13 = por %p696_p12, %p695_p11 }
  0x1e   :  { %p698_p0 = pnand %p697_p13, %p691_p10 }
  0x20   :  { %701 = shalt.err (!%p698_p0)
}
  0x21   :  { %42 = dma.hbm_to_vmem [thread:$0]  %s858_s2, 64, %s40_s22, [#allocation6]  }
  0x22   :  { %722 = dma.done.wait [#allocation3], 64  }
  0x23   :  { %723 = vsyncadd [#allocation3], 4294967232 }
  0x24   :  { %724 = dma.done.wait [#allocation6], 9792  }
  0x25   :  { %725 = vsyncadd [#allocation6], 4294957504  ;;  %v733_v0 = vmov 0.0   ;;  %v67_v1 = vld [vmem:[#allocation5 + $0x78] sm:$0xff]  ;;  %v66_v2 = vld [vmem:[#allocation5 + $0x70] sm:$0xff]  ;;  %vm147_vm0 = vcmask 785408  }
  0x26   :  { %150 = vmatprep.subr.mxu0 %v733_v0  ;;  %525 = vmatprep.subr.mxu1 %v733_v0  ;;  %v65_v3 = vld [vmem:[#allocation5 + $0x68] sm:$0xff]  ;;  %v64_v4 = vld [vmem:[#allocation5 + $0x60] sm:$0xff]  ;;  %v63_v5 = vld [vmem:[#allocation5 + $0x58] sm:$0xff]  ;;  %vm734_vm1 = vmmov 0   ;;  %s735_s0 = smov [#allocation8]  }
  0x27   :  { %151 = vmatpush1.msra.mxu0 %v67_v1  ;;  %v62_v6 = vld [vmem:[#allocation5 + $0x50] sm:$0xff]  ;;  %v771_v7 = vld.sshfl [vmem:[#allocation2] sm:$0x33 pattern:$0x76325410]  ;;  %v61_v9 = vld [vmem:[#allocation5 + $0x48] sm:$0xff]  ;;  %557 = vmatprep.mubr.msk.f32.mxu1 %vm734_vm1, %v733_v0 }
  0x28   :  { %152 = vmatprep.subr.mxu0 %v733_v0  ;;  %v95_v8 = vld [vmem:[#allocation5 + $0x158] sm:$0xff]  ;;  %v145_v10 = vcombine.high %v771_v7, %v771_v7  ;;  %v94_v11 = vld [vmem:[#allocation5 + $0x150] sm:$0xff]  ;;  %v60_v12 = vld [vmem:[#allocation5 + $0x40] sm:$0xff]  ;;  %s457_s2 = sshll.u32 %s735_s0, 4  ;;  %s458_s2 = int_to_ptr.vmem [resolvable:$true] %s457_s2 }
  0x29   :  { %153 = vmatpush1.msra.mxu0 %v66_v2  ;;  %526 = vmatpush3.msra.mxu1 %v95_v8  ;;  %v93_v13 = vld [vmem:[#allocation5 + $0x148] sm:$0xff]  ;;  %v59_v14 = vld [vmem:[#allocation5 + $0x38] sm:$0xff]  ;;  %v92_v15 = vld [vmem:[#allocation5 + $0x140] sm:$0xff]  ;;  %s702_s28 = scalar_lea.vmem %s458_s2, 32  ;;  %p707_p2 = scmp.lt.s32.totalorder %s458_s2, %s458_s2 }
  0x2a   :  { %154 = vmatprep.subr.mxu0 %v733_v0  ;;  %527 = vmatprep.subr.mxu1 %v733_v0  ;;  %v58_v16 = vld [vmem:[#allocation5 + $0x30] sm:$0xff]  ;;  %v91_v17 = vld [vmem:[#allocation5 + $0x138] sm:$0xff]  ;;  %v57_v18 = vld [vmem:[#allocation5 + $0x28] sm:$0xff]  ;;  %p703_p1 = scmp.ne.s32.totalorder %s458_s2, %s702_s28  ;;  %p708_p3 = scmp.lt.s32.totalorder %s702_s28, %s702_s28 }
  0x2b   :  { %155 = vmatpush1.msra.mxu0 %v65_v3  ;;  %469 = vmatprep.mubr.msk.f32.mxu0 %vm147_vm0, %v145_v10  ;;  %v90_v19 = vld [vmem:[#allocation5 + $0x130] sm:$0xff]  ;;  %v56_v20 = vld [vmem:[#allocation5 + $0x20] sm:$0xff]  ;;  %v89_v21 = vld [vmem:[#allocation5 + $0x128] sm:$0xff] }
  0x2c   :  { %156 = vmatprep.subr.mxu0 %v733_v0  ;;  %528 = vmatpush3.msra.mxu1 %v94_v11  ;;  %v55_v22 = vld [vmem:[#allocation5 + $0x18] sm:$0xff]  ;;  %v88_v23 = vld [vmem:[#allocation5 + $0x120] sm:$0xff]  ;;  %v54_v24 = vld [vmem:[#allocation5 + $0x10] sm:$0xff]  ;;  %p709_p4 = por %p708_p3, %p707_p2 }
  0x2d   :  { %157 = vmatpush1.msra.mxu0 %v64_v4  ;;  %529 = vmatprep.subr.mxu1 %v733_v0  ;;  %v87_v25 = vld [vmem:[#allocation5 + $0x118] sm:$0xff]  ;;  %v53_v26 = vld [vmem:[#allocation5 + $0x8] sm:$0xff]  ;;  %v86_v27 = vld [vmem:[#allocation5 + $0x110] sm:$0xff] }
  0x2e   :  { %158 = vmatprep.subr.mxu0 %v733_v0  ;;  %530 = vmatpush3.msra.mxu1 %v93_v13  ;;  %v52_v28 = vld [vmem:[#allocation5] sm:$0xff]  ;;  %v85_v29 = vld [vmem:[#allocation5 + $0x108] sm:$0xff]  ;;  %v79_v30 = vld [vmem:[#allocation5 + $0xd8] sm:$0xff]  ;;  %p710_p5 = pnand %p709_p4, %p703_p1 }
  0x2f   :  { %159 = vmatpush1.msra.mxu0 %v63_v5  ;;  %531 = vmatprep.subr.mxu1 %v733_v0  ;;  %v84_v31 = vld [vmem:[#allocation5 + $0x100] sm:$0xff]  ;;  %v78_v32 = vld [vmem:[#allocation5 + $0xd0] sm:$0xff]  ;;  %v83_v33 = vld [vmem:[#allocation5 + $0xf8] sm:$0xff] }
  0x30   :  { %160 = vmatprep.subr.mxu0 %v733_v0  ;;  %532 = vmatpush3.msra.mxu1 %v92_v15  ;;  %v77_v34 = vld [vmem:[#allocation5 + $0xc8] sm:$0xff]  ;;  %v82_v35 = vld [vmem:[#allocation5 + $0xf0] sm:$0xff]  ;;  %v76_v36 = vld [vmem:[#allocation5 + $0xc0] sm:$0xff] }
  0x31   :  { %161 = vmatpush1.msra.mxu0 %v62_v6  ;;  %533 = vmatprep.subr.mxu1 %v733_v0  ;;  %v75_v37 = vld [vmem:[#allocation5 + $0xb8] sm:$0xff]  ;;  %v74_v38 = vld [vmem:[#allocation5 + $0xb0] sm:$0xff]  ;;  %v73_v39 = vld [vmem:[#allocation5 + $0xa8] sm:$0xff] }
  0x32   :  { %162 = vmatprep.subr.mxu0 %v733_v0  ;;  %534 = vmatpush3.msra.mxu1 %v91_v17  ;;  %v72_v40 = vld [vmem:[#allocation5 + $0xa0] sm:$0xff]  ;;  %v71_v41 = vld [vmem:[#allocation5 + $0x98] sm:$0xff]  ;;  %v70_v42 = vld [vmem:[#allocation5 + $0x90] sm:$0xff] }
  0x33   :  { %163 = vmatpush1.msra.mxu0 %v61_v9  ;;  %535 = vmatprep.subr.mxu1 %v733_v0  ;;  %v69_v43 = vld [vmem:[#allocation5 + $0x88] sm:$0xff]  ;;  %v68_v44 = vld [vmem:[#allocation5 + $0x80] sm:$0xff]  ;;  %v111_v50 = vld [vmem:[#allocation5 + $0x1d8] sm:$0xff] }
  0x34   :  { %164 = vmatprep.subr.mxu0 %v733_v0  ;;  %536 = vmatpush3.msra.mxu1 %v90_v19  ;;  %v81_v45 = vld [vmem:[#allocation5 + $0xe8] sm:$0xff]  ;;  %v80_v46 = vld [vmem:[#allocation5 + $0xe0] sm:$0xff]  ;;  %v110_v52 = vld [vmem:[#allocation5 + $0x1d0] sm:$0xff] }
  0x35   :  { %165 = vmatpush1.msra.mxu0 %v60_v12  ;;  %537 = vmatprep.subr.mxu1 %v733_v0  ;;  %v467_v47 = vld [vmem:[#allocation7] ss:$0 sm:$0xff]  ;;  %v109_v53 = vld [vmem:[#allocation5 + $0x1c8] sm:$0xff]  ;;  %v107_v55 = vld [vmem:[#allocation5 + $0x1b8] sm:$0xff] }
  0x36   :  { %166 = vmatprep.subr.mxu0 %v733_v0  ;;  %538 = vmatpush3.msra.mxu1 %v89_v21  ;;  %v108_v54 = vld [vmem:[#allocation5 + $0x1c0] sm:$0xff]  ;;  %v106_v56 = vld [vmem:[#allocation5 + $0x1b0] sm:$0xff]  ;;  %v105_v57 = vld [vmem:[#allocation5 + $0x1a8] sm:$0xff] }
  0x37   :  { %167 = vmatpush1.msra.mxu0 %v59_v14  ;;  %539 = vmatprep.subr.mxu1 %v733_v0  ;;  %v104_v58 = vld [vmem:[#allocation5 + $0x1a0] sm:$0xff]  ;;  %v103_v59 = vld [vmem:[#allocation5 + $0x198] sm:$0xff]  ;;  %v102_v60 = vld [vmem:[#allocation5 + $0x190] sm:$0xff] }
  0x38   :  { %168 = vmatprep.subr.mxu0 %v733_v0  ;;  %540 = vmatpush3.msra.mxu1 %v88_v23  ;;  %v101_v61 = vld [vmem:[#allocation5 + $0x188] sm:$0xff]  ;;  %v100_v62 = vld [vmem:[#allocation5 + $0x180] sm:$0xff]  ;;  %v99_v63 = vld [vmem:[#allocation5 + $0x178] sm:$0xff] }
  0x39   :  { %169 = vmatpush1.msra.mxu0 %v58_v16  ;;  %541 = vmatprep.subr.mxu1 %v733_v0  ;;  %v98_v1 = vld [vmem:[#allocation5 + $0x170] sm:$0xff]  ;;  %v97_v2 = vld [vmem:[#allocation5 + $0x168] sm:$0xff]  ;;  %v96_v3 = vld [vmem:[#allocation5 + $0x160] sm:$0xff] }
  0x3a   :  { %170 = vmatprep.subr.mxu0 %v733_v0  ;;  %542 = vmatpush3.msra.mxu1 %v87_v25  ;;  %v470_v4 = vld [vmem:[#allocation7 + $0x1] ss:$0 sm:$0xff]  ;;  %v127_v9 = vld [vmem:[#allocation5 + $0x258] sm:$0xff]  ;;  %v126_v10 = vld [vmem:[#allocation5 + $0x250] sm:$0xff] }
  0x3b   :  { %171 = vmatpush1.msra.mxu0 %v57_v18  ;;  %543 = vmatprep.subr.mxu1 %v733_v0  ;;  %v125_v11 = vld [vmem:[#allocation5 + $0x248] sm:$0xff]  ;;  %v124_v12 = vld [vmem:[#allocation5 + $0x240] sm:$0xff]  ;;  %v123_v13 = vld [vmem:[#allocation5 + $0x238] sm:$0xff] }
  0x3c   :  { %172 = vmatprep.subr.mxu0 %v733_v0  ;;  %544 = vmatpush3.msra.mxu1 %v86_v27  ;;  %v122_v14 = vld [vmem:[#allocation5 + $0x230] sm:$0xff]  ;;  %v121_v15 = vld [vmem:[#allocation5 + $0x228] sm:$0xff]  ;;  %v120_v16 = vld [vmem:[#allocation5 + $0x220] sm:$0xff] }
  0x3d   :  { %173 = vmatpush1.msra.mxu0 %v56_v20  ;;  %545 = vmatprep.subr.mxu1 %v733_v0  ;;  %v119_v17 = vld [vmem:[#allocation5 + $0x218] sm:$0xff]  ;;  %v118_v18 = vld [vmem:[#allocation5 + $0x210] sm:$0xff]  ;;  %v117_v19 = vld [vmem:[#allocation5 + $0x208] sm:$0xff] }
  0x3e   :  { %174 = vmatprep.subr.mxu0 %v733_v0  ;;  %546 = vmatpush3.msra.mxu1 %v85_v29  ;;  %v116_v20 = vld [vmem:[#allocation5 + $0x200] sm:$0xff]  ;;  %v115_v21 = vld [vmem:[#allocation5 + $0x1f8] sm:$0xff]  ;;  %v113_v23 = vld [vmem:[#allocation5 + $0x1e8] sm:$0xff] }
  0x3f   :  { %175 = vmatpush1.msra.mxu0 %v55_v22  ;;  %547 = vmatprep.subr.mxu1 %v733_v0  ;;  %v114_v22 = vld [vmem:[#allocation5 + $0x1f0] sm:$0xff]  ;;  %v471_v25 = vld [vmem:[#allocation7 + $0x2] ss:$0 sm:$0xff] }
  0x40   :  { %176 = vmatprep.subr.mxu0 %v733_v0  ;;  %548 = vmatpush3.msra.mxu1 %v84_v31 }
  0x41   :  { %177 = vmatpush1.msra.mxu0 %v54_v24  ;;  %549 = vmatprep.subr.mxu1 %v733_v0  ;;  %v112_v24 = vld [vmem:[#allocation5 + $0x1e0] sm:$0xff] }
  0x42   :  { %178 = vmatprep.subr.mxu0 %v733_v0  ;;  %550 = vmatpush3.msra.mxu1 %v83_v33 }
  0x43   :  { %179 = vmatpush1.msra.mxu0 %v53_v26  ;;  %551 = vmatprep.subr.mxu1 %v733_v0 }
  0x44   :  { %180 = vmatprep.subr.mxu0 %v733_v0  ;;  %552 = vmatpush3.msra.mxu1 %v82_v35 }
  0x45   :  { %181 = vmatpush1.msra.mxu0 %v52_v28  ;;  %553 = vmatprep.subr.mxu1 %v733_v0 }
  0x46   :  { %190 = vmatprep.subr.mxu0 %v733_v0  ;;  %554 = vmatpush3.msra.mxu1 %v81_v45 }
  0x47   :  { %191 = vmatpush2.msra.mxu0 %v79_v30  ;;  %555 = vmatprep.subr.mxu1 %v733_v0 }
  0x48   :  { %192 = vmatprep.subr.mxu0 %v733_v0  ;;  %556 = vmatpush3.msra.mxu1 %v80_v46 }
  0x49   :  { %193 = vmatpush2.msra.mxu0 %v78_v32  ;;  %560 = vmatprep.subr.mxu1 %v733_v0 }
  0x4a   :  { %194 = vmatprep.subr.mxu0 %v733_v0 }
  0x4b   :  { %195 = vmatpush2.msra.mxu0 %v77_v34  ;;  %v473_v34 = vld [vmem:[#allocation7 + $0x3] ss:$0 sm:$0xff] }
  0x4c   :  { %196 = vmatprep.subr.mxu0 %v733_v0 }
  0x4d   :  { %197 = vmatpush2.msra.mxu0 %v76_v36 }
  0x4e   :  { %198 = vmatprep.subr.mxu0 %v733_v0 }
  0x4f   :  { %199 = vmatpush2.msra.mxu0 %v75_v37 }
  0x50   :  { %200 = vmatprep.subr.mxu0 %v733_v0 }
  0x51   :  { %201 = vmatpush2.msra.mxu0 %v74_v38 }
  0x52   :  { %202 = vmatprep.subr.mxu0 %v733_v0 }
  0x53   :  { %203 = vmatpush2.msra.mxu0 %v73_v39 }
  0x54   :  { %204 = vmatprep.subr.mxu0 %v733_v0 }
  0x55   :  { %205 = vmatpush2.msra.mxu0 %v72_v40 }
  0x56   :  { %206 = vmatprep.subr.mxu0 %v733_v0 }
  0x57   :  { %207 = vmatpush2.msra.mxu0 %v71_v41 }
  0x58   :  { %208 = vmatprep.subr.mxu0 %v733_v0 }
  0x59   :  { %209 = vmatpush2.msra.mxu0 %v70_v42 }
  0x5a   :  { %210 = vmatprep.subr.mxu0 %v733_v0 }
  0x5b   :  { %211 = vmatpush2.msra.mxu0 %v69_v43 }
  0x5c   :  { %212 = vmatprep.subr.mxu0 %v733_v0 }
  0x5d   :  { %213 = vmatpush2.msra.mxu0 %v68_v44 }
  0x5e   :  { %215 = vmatmul.mubr.f32.vlgmr.msra.gmra.mxu0 %v771_v7  ;;  %595 = vmatprep.subr.mxu0 %v733_v0 }
  0x5f   :  { %627 = vmatprep.mubr.msk.f32.mxu0 %vm734_vm1, %v733_v0  ;;  %596 = vmatpush3.msra.mxu0 %v127_v9 }
  0x60   :  { %597 = vmatprep.subr.mxu0 %v733_v0 }
  0x61   :  { %598 = vmatpush3.msra.mxu0 %v126_v10 }
  0x62   :  { %599 = vmatprep.subr.mxu0 %v733_v0 }
  0x63   :  { %600 = vmatpush3.msra.mxu0 %v125_v11 }
  0x64   :  { %601 = vmatprep.subr.mxu0 %v733_v0 }
  0x65   :  { %602 = vmatpush3.msra.mxu0 %v124_v12 }
  0x66   :  { %603 = vmatprep.subr.mxu0 %v733_v0 }
  0x67   :  { %604 = vmatpush3.msra.mxu0 %v123_v13 }
  0x68   :  { %605 = vmatprep.subr.mxu0 %v733_v0 }
  0x69   :  { %606 = vmatpush3.msra.mxu0 %v122_v14 }
  0x6a   :  { %607 = vmatprep.subr.mxu0 %v733_v0 }
  0x6b   :  { %608 = vmatpush3.msra.mxu0 %v121_v15 }
  0x6c   :  { %609 = vmatprep.subr.mxu0 %v733_v0 }
  0x6d   :  { %610 = vmatpush3.msra.mxu0 %v120_v16 }
  0x6e   :  { %611 = vmatprep.subr.mxu0 %v733_v0 }
  0x6f   :  { %612 = vmatpush3.msra.mxu0 %v119_v17 }
  0x70   :  { %613 = vmatprep.subr.mxu0 %v733_v0 }
  0x71   :  { %614 = vmatpush3.msra.mxu0 %v118_v18 }
  0x72   :  { %615 = vmatprep.subr.mxu0 %v733_v0 }
  0x73   :  { %616 = vmatpush3.msra.mxu0 %v117_v19 }
  0x74   :  { %617 = vmatprep.subr.mxu0 %v733_v0 }
  0x75   :  { %618 = vmatpush3.msra.mxu0 %v116_v20 }
  0x76   :  { %619 = vmatprep.subr.mxu0 %v733_v0 }
  0x77   :  { %620 = vmatpush3.msra.mxu0 %v115_v21 }
  0x78   :  { %621 = vmatprep.subr.mxu0 %v733_v0 }
  0x79   :  { %622 = vmatpush3.msra.mxu0 %v114_v22 }
  0x7a   :  { %623 = vmatprep.subr.mxu0 %v733_v0 }
  0x7b   :  { %624 = vmatpush3.msra.mxu0 %v113_v23 }
  0x7c   :  { %625 = vmatprep.subr.mxu0 %v733_v0 }
  0x7d   :  { %626 = vmatpush3.msra.mxu0 %v112_v24 }
 0x11e   :  { %v216_v48 = vpop.f32.mrf.mxu0 }
 0x11f   :  { %v818_v49 = vadd.f32 %v467_v47, %v216_v48 }
 0x120   :  { %v218_v51 = vpop.f32.mrf.mxu0 }
 0x121   :  { %558 = vmatmul.mubr.f32.vlgmr.msra.gmra.mxu1 %v818_v49 }
 0x122   :  { %561 = vmatpush3.msra.mxu1 %v111_v50  ;;  %592 = vmatprep.mubr.msk.f32.mxu1 %vm734_vm1, %v733_v0 }
 0x123   :  { %562 = vmatprep.subr.mxu1 %v733_v0 }
 0x124   :  { %563 = vmatpush3.msra.mxu1 %v110_v52 }
 0x125   :  { %564 = vmatprep.subr.mxu1 %v733_v0 }
 0x126   :  { %565 = vmatpush3.msra.mxu1 %v109_v53 }
 0x127   :  { %566 = vmatprep.subr.mxu1 %v733_v0 }
 0x128   :  { %567 = vmatpush3.msra.mxu1 %v108_v54 }
 0x129   :  { %568 = vmatprep.subr.mxu1 %v733_v0 }
 0x12a   :  { %569 = vmatpush3.msra.mxu1 %v107_v55 }
 0x12b   :  { %570 = vmatprep.subr.mxu1 %v733_v0 }
 0x12c   :  { %571 = vmatpush3.msra.mxu1 %v106_v56 }
 0x12d   :  { %572 = vmatprep.subr.mxu1 %v733_v0 }
 0x12e   :  { %573 = vmatpush3.msra.mxu1 %v105_v57 }
 0x12f   :  { %574 = vmatprep.subr.mxu1 %v733_v0 }
 0x130   :  { %575 = vmatpush3.msra.mxu1 %v104_v58 }
 0x131   :  { %576 = vmatprep.subr.mxu1 %v733_v0 }
 0x132   :  { %577 = vmatpush3.msra.mxu1 %v103_v59 }
 0x133   :  { %578 = vmatprep.subr.mxu1 %v733_v0 }
 0x134   :  { %579 = vmatpush3.msra.mxu1 %v102_v60 }
 0x135   :  { %580 = vmatprep.subr.mxu1 %v733_v0 }
 0x136   :  { %581 = vmatpush3.msra.mxu1 %v101_v61 }
 0x137   :  { %582 = vmatprep.subr.mxu1 %v733_v0 }
 0x138   :  { %583 = vmatpush3.msra.mxu1 %v100_v62 }
 0x139   :  { %584 = vmatprep.subr.mxu1 %v733_v0 }
 0x13a   :  { %585 = vmatpush3.msra.mxu1 %v99_v63 }
 0x13b   :  { %586 = vmatprep.subr.mxu1 %v733_v0 }
 0x13c   :  { %587 = vmatpush3.msra.mxu1 %v98_v1 }
 0x13d   :  { %588 = vmatprep.subr.mxu1 %v733_v0 }
 0x13e   :  { %589 = vmatpush3.msra.mxu1 %v97_v2 }
 0x13f   :  { %590 = vmatprep.subr.mxu1 %v733_v0 }
 0x140   :  { %591 = vmatpush3.msra.mxu1 %v96_v3 }
 0x1e1   :  { %v290_v5 = vpop.f32.mrf.mxu1 }
 0x1e2   :  { %v291_v6 = vadd.f32 %v470_v4, %v290_v5 }
 0x1e3   :  { %v559_v7 = vpop.f32.mrf.mxu1 }
 0x1e4   :  { %v294_v8 = vmax.f32 %v291_v6, 0.0 }
 0x1e6   :  { %593 = vmatmul.mubr.f32.vlgmr.msra.gmra.mxu1 %v294_v8 }
 0x2a6   :  { %v365_v26 = vpop.f32.mrf.mxu1 }
 0x2a7   :  { %v366_v27 = vadd.f32 %v471_v25, %v365_v26 }
 0x2a8   :  { %v594_v28 = vpop.f32.mrf.mxu1 }
 0x2a9   :  { %v472_v29 = vmul.f32 -1.442695, %v366_v27 }
 0x2ab   :  { %638 = vpow2.f32 %v472_v29 }
 0x2b8   :  { %v639_v30 = vpop.eup %638 }
 0x2b9   :  { %v372_v31 = vadd.f32 1.0, %v639_v30 }
 0x2bb   :  { %640 = vrcp.f32 %v372_v31 }
 0x2c8   :  { %v641_v32 = vpop.eup %640 }
 0x2c9   :  { %v375_v33 = vmul.f32 %v641_v32, %v818_v49 }
 0x2cb   :  { %628 = vmatmul.mubr.f32.vlgmr.msra.gmra.mxu0 %v375_v33 }
 0x38b   :  { %v446_v35 = vpop.f32.mrf.mxu0 }
 0x38c   :  { %v447_v36 = vadd.f32 %v473_v34, %v446_v35 }
 0x38d   :  { %v629_v0 = vpop.f32.mrf.mxu0 }
 0x38e   :  { %450 = vst [vmem:[#allocation8] sm:$0x3] %v447_v36 }
 0x38f   :  { %713 = shalt.err (!%p710_p5)
}
 0x390   :  { %460 = dma.vmem_to_hbm [thread:$0]  %s458_s2, 32, %s859_s3, [#allocation4]  }
 0x391   :  { %726 = dma.done.wait [#allocation4], 32  }
 0x392   :  { %727 = vsyncadd [#allocation4], 4294967264 }
 0x393   :  { %464 = vsyncpa [#allocation3], 1 }
 0x394   :  { %465 = vsyncpa [#allocation6], 1 }
 0x395   :  { %466 = vsyncpa [#allocation4], 1 }

</bundles_post_ra>
